<compile_context>
chip_gen: v7x
topology: tpu7x:2x2x1
jax: 0.10.0
libtpu: 0.0.40
codegen_flags: <defaults>
</compile_context>

<pallas_src>
import functools

import jax
import jax.numpy as jnp
import numpy as np
from jax import lax
from jax.experimental import pallas as pl
from jax.experimental.pallas import tpu as pltpu


_VMEM_SLACK_BYTES = 4 * 1024 * 1024        # headroom for compiler-internal scratch


def _round_up(n, m):
    return ((n + m - 1) // m) * m


def _vmem_limit_bytes():
    """Generation-aware scoped-VMEM limit (~75% of physical per-core VMEM)."""
    cap = 0
    try:
        cap = int(pltpu.get_tpu_info().vmem_capacity_bytes)
    except Exception:
        cap = 0
    if cap <= 0:
        cap = 64 * 1024 * 1024             # conservative fallback: v7x per-core VMEM
    return max(cap * 3 // 4, 32 * 1024 * 1024)


def _choose_tile_hw(hw, c_pad, dsize, vmem_limit):
    """Largest lane-aligned HW tile whose two-pass resident set fits VMEM."""
    attn_bytes = c_pad * c_pad * 4
    # Pass 2: double-buffered f32 attn + double-buffered x and out tiles.
    budget2 = vmem_limit - _VMEM_SLACK_BYTES - 2 * attn_bytes
    # Pass 1: double-buffered attn output + softmax temporaries + x tiles.
    budget1 = vmem_limit - _VMEM_SLACK_BYTES - 4 * attn_bytes
    t2 = budget2 // (4 * c_pad * dsize)
    t1 = budget1 // (2 * c_pad * dsize)
    t = (min(t1, t2) // 128) * 128
    t = max(t, 128)                         # degrade gracefully for very large C
    return min(t, max(128, (hw // 128) * 128))


def _fused_fits(hw, c_pad, dsize, vmem_limit):
    """Can a whole (C_pad, HW) slab (plus temporaries) live in VMEM at once?"""
    hw_lanes = _round_up(hw, 128)
    need = (4 * c_pad * hw_lanes * dsize    # double-buffered x + out blocks
            + 2 * c_pad * hw_lanes * 4      # f32 matmul result / upcast temporaries
            + 6 * c_pad * c_pad * 4)        # energy / softmax / attn temporaries
    return need <= vmem_limit - 2 * _VMEM_SLACK_BYTES


def _scaled_softmax_neg_energy(energy, c_valid, scale):
    """scale * softmax(rowmax(E) - E) == scale * softmax(-E), padded cols masked."""
    c_pad = energy.shape[-1]
    if c_valid != c_pad:
        col = lax.broadcasted_iota(jnp.int32, energy.shape, 1)
        valid = col < c_valid
        # Padded channel columns must be excluded from BOTH the row-min and the
        # exp/sum, otherwise their zero energies poison the shift -> NaN softmax.
        m = jnp.min(jnp.where(valid, energy, jnp.inf), axis=-1, keepdims=True)
        p = jnp.exp(jnp.where(valid, m - energy, -jnp.inf))
    else:
        m = jnp.min(energy, axis=-1, keepdims=True)
        p = jnp.exp(m - energy)
    denom = jnp.sum(p, axis=-1, keepdims=True)
    return p * (scale * pl.reciprocal(denom, approx=False))


def _fused_kernel(gamma_ref, x_ref, o_ref, *, c_valid):
    """Single pass per batch: energy -> softmax(-E) -> gamma*attn @ x + x."""
    x = x_ref[0]                                           # (C_pad, HW), native dtype
    # TODO(synk): check the lowering of this x @ x^T for an inserted vreg
    # transpose (vxpose); if the XLU slot saturates, feed a pre-transposed RHS.
    energy = lax.dot_general(
        x, x, dimension_numbers=(((1,), (1,)), ((), ())),
        preferred_element_type=jnp.float32)                # (C_pad, C_pad) f32
    attn = _scaled_softmax_neg_energy(energy, c_valid, gamma_ref[0])
    out = jnp.dot(attn.astype(x.dtype), x, preferred_element_type=jnp.float32)
    o_ref[0] = (out + x.astype(jnp.float32)).astype(o_ref.dtype)


def _energy_softmax_kernel(gamma_ref, x_ref, attn_ref, *, c_valid, hw_valid, tile_hw):
    """Pass 1: accumulate energy over HW tiles into the resident output block,
    then (last tile) softmax(-energy) with gamma folded in."""
    j = pl.program_id(1)

    @pl.when(j == 0)
    def _():
        attn_ref[...] = jnp.zeros_like(attn_ref)

    x = x_ref[0]                                           # (C_pad, tile_hw)
    if hw_valid % tile_hw != 0:
        # Ragged last HW tile: OOB columns read garbage -> zero them (select,
        # not multiply, so NaN garbage cannot propagate).
        col = lax.broadcasted_iota(jnp.int32, x.shape, 1)
        x = jnp.where(col + j * tile_hw < hw_valid, x, jnp.zeros_like(x))

    attn_ref[0] += lax.dot_general(
        x, x, dimension_numbers=(((1,), (1,)), ((), ())),
        preferred_element_type=jnp.float32)

    @pl.when(j == pl.num_programs(1) - 1)
    def _():
        attn_ref[0] = _scaled_softmax_neg_energy(attn_ref[0], c_valid, gamma_ref[0])


def _apply_kernel(attn_ref, x_ref, o_ref):
    """Pass 2: out_tile = attn @ x_tile + x_tile (gamma already folded into attn)."""
    x = x_ref[0]                                           # (C_pad, tile_hw)
    attn = attn_ref[0]                                     # (C_pad, C_pad) f32
    if attn.dtype != x.dtype:
        attn = attn.astype(x.dtype)                        # keep the MXU in x's dtype
    out = jnp.dot(attn, x, preferred_element_type=jnp.float32)
    o_ref[0] = (out + x.astype(jnp.float32)).astype(o_ref.dtype)


def channel_attention(x, gamma, *, tile_hw=None, force_two_pass=False):
    """x: (B, C, H, W); gamma: scalar / shape-(1,) parameter.  Returns (B, C, H, W)."""
    b, c, h, w = x.shape
    hw = h * w
    dsize = jnp.dtype(x.dtype).itemsize
    c_pad = _round_up(c, 128)                              # MXU / lane alignment

    x_flat = x.reshape(b, c, hw)
    if c_pad != c:
        # Channel pad only (no HW pad). Typical DANet channel counts (512, ...)
        # are already multiples of 128, making this a no-op.
        x_flat = jnp.pad(x_flat, ((0, 0), (0, c_pad - c), (0, 0)))
    gamma_f32 = jnp.asarray(gamma, jnp.float32).reshape((1,))

    vmem_limit = _vmem_limit_bytes()

    if not force_two_pass and _fused_fits(hw, c_pad, dsize, vmem_limit):
        # ---- single pass: x stays resident -> one HBM read + one write of x --
        out_p = pl.pallas_call(
            functools.partial(_fused_kernel, c_valid=c),
            out_shape=jax.ShapeDtypeStruct((b, c_pad, hw), x.dtype),
            grid_spec=pltpu.PrefetchScalarGridSpec(
                num_scalar_prefetch=1,                     # gamma -> SMEM
                grid=(b,),
                in_specs=[pl.BlockSpec((1, c_pad, hw), lambda i, g: (i, 0, 0))],
                out_specs=pl.BlockSpec((1, c_pad, hw), lambda i, g: (i, 0, 0)),
            ),
            compiler_params=pltpu.CompilerParams(
                dimension_semantics=("parallel",),
                vmem_limit_bytes=vmem_limit),
            cost_estimate=pl.CostEstimate(
                flops=4 * b * c_pad * c_pad * hw,
                transcendentals=b * c_pad * c_pad,
                bytes_accessed=2 * b * c_pad * hw * dsize),
        )(gamma_f32, x_flat)
    else:
        if tile_hw is None:
            tile_hw = _choose_tile_hw(hw, c_pad, dsize, vmem_limit)
        tile_hw = max(128, (tile_hw // 128) * 128)
        n_hw = pl.cdiv(hw, tile_hw)

        # ---- pass 1: attn = gamma * softmax_channels(-(x x^T)) --------------
        attn = pl.pallas_call(
            functools.partial(_energy_softmax_kernel,
                              c_valid=c, hw_valid=hw, tile_hw=tile_hw),
            out_shape=jax.ShapeDtypeStruct((b, c_pad, c_pad), jnp.float32),
            grid_spec=pltpu.PrefetchScalarGridSpec(
                num_scalar_prefetch=1,                     # gamma -> SMEM
                grid=(b, n_hw),
                in_specs=[
                    pl.BlockSpec((1, c_pad, tile_hw), lambda i, j, g: (i, 0, j)),
                ],
                out_specs=pl.BlockSpec((1, c_pad, c_pad), lambda i, j, g: (i, 0, 0)),
            ),
            compiler_params=pltpu.CompilerParams(
                dimension_semantics=("parallel", "arbitrary"),
                vmem_limit_bytes=vmem_limit),
            cost_estimate=pl.CostEstimate(
                flops=2 * b * c_pad * c_pad * hw,
                transcendentals=b * c_pad * c_pad,
                bytes_accessed=b * c_pad * hw * dsize + b * c_pad * c_pad * 4),
        )(gamma_f32, x_flat)

        # ---- pass 2: out = attn @ x + x (fully parallel over tiles) ---------
        out_p = pl.pallas_call(
            _apply_kernel,
            out_shape=jax.ShapeDtypeStruct((b, c_pad, hw), x.dtype),
            grid_spec=pltpu.PrefetchScalarGridSpec(
                num_scalar_prefetch=0,
                grid=(b, n_hw),
                in_specs=[
                    pl.BlockSpec((1, c_pad, c_pad), lambda i, j: (i, 0, 0)),
                    pl.BlockSpec((1, c_pad, tile_hw), lambda i, j: (i, 0, j)),
                ],
                out_specs=pl.BlockSpec((1, c_pad, tile_hw), lambda i, j: (i, 0, j)),
            ),
            compiler_params=pltpu.CompilerParams(
                dimension_semantics=("parallel", "parallel"),
                vmem_limit_bytes=vmem_limit),
            cost_estimate=pl.CostEstimate(
                flops=2 * b * c_pad * c_pad * hw,
                transcendentals=0,
                bytes_accessed=2 * b * c_pad * hw * dsize + b * c_pad * c_pad * 4),
        )(attn, x_flat)

    if c_pad != c:                                         # no-op for aligned C
        out_p = out_p[:, :c, :]
    return out_p.reshape(b, c, h, w)


def channel_attention_ref(x, gamma):
    """Pure-JAX reference mirroring the PyTorch forward."""
    b, c, h, w = x.shape
    q = x.reshape(b, c, h * w).astype(jnp.float32)
    k = jnp.transpose(q, (0, 2, 1))
    energy = jnp.einsum('bce,bef->bcf', q, k, precision=lax.Precision.HIGHEST)
    energy = jnp.max(energy, axis=-1, keepdims=True) - energy
    attn = jax.nn.softmax(energy, axis=-1)
    out = jnp.einsum('bcd,bde->bce', attn, q,
                     precision=lax.Precision.HIGHEST).reshape(b, c, h, w)
    g = jnp.asarray(gamma, jnp.float32).reshape(())
    return (g * out + x.astype(jnp.float32)).astype(x.dtype)


if __name__ == "__main__":
    def check(x, gamma, rtol=1e-5, atol=1e-5, **kw):
        out = channel_attention(x, gamma, **kw)
        jax.block_until_ready(out)
        ref = channel_attention_ref(x, gamma)
        np.testing.assert_allclose(np.asarray(out), np.asarray(ref),
                                   rtol=rtol, atol=atol)

    # Shapes implied by the module (small): batch=2, channels=4, spatial=16.
    x0 = jax.random.normal(jax.random.PRNGKey(0), (2, 4, 16, 16), dtype=jnp.float32)
    gamma0 = jnp.zeros((1,), dtype=jnp.float32)            # nn.Parameter(torch.zeros(1))
    check(x0, gamma0)                                      # fused path, gamma = 0

    gamma1 = jnp.array([0.5], dtype=jnp.float32)
    check(x0, gamma1)                                      # fused path, attention active
    check(x0, gamma1, force_two_pass=True, tile_hw=128)    # two-pass, multi-tile HW accum

    # Ragged HW (225 not a multiple of the tile) + padded channel columns.
    x1 = jax.random.normal(jax.random.PRNGKey(1), (2, 4, 15, 15), dtype=jnp.float32)
    check(x1, gamma1)                                      # fused
    check(x1, gamma1, force_two_pass=True, tile_hw=128)    # ragged last-tile masking

    # Lane-aligned channel count (no channel padding / masking branch).
    x2 = jax.random.normal(jax.random.PRNGKey(2), (1, 128, 16, 16), dtype=jnp.float32)
    gamma2 = jnp.array([0.7], dtype=jnp.float32)
    check(x2, gamma2, rtol=1e-4, atol=1e-4)                # fused
    check(x2, gamma2, rtol=1e-4, atol=1e-4, force_two_pass=True, tile_hw=128)

    print("KERNEL_OK")
</pallas_src>

<mosaic_0001>
module attributes {stable_mosaic.version = 11 : i64} {
  func.func @_fused_kernel(%arg0: i32, %arg1: memref<1xf32, #tpu.memory_space<smem>>, %arg2: memref<1x128x256xf32, #tpu.memory_space<vmem>>, %arg3: memref<1x128x256xf32, #tpu.memory_space<vmem>>) attributes {dimension_semantics = [#tpu.dimension_semantics<parallel>], iteration_bounds = array<i64: 2>, scalar_prefetch = 1 : i64, scratch_operands = 0 : i64, tpu.core_type = #tpu.core_type<tc>, window_params = [{transform_indices = @transform_0, window_bounds = array<i64: 1, 128, 256>}, {transform_indices = @transform_1, window_bounds = array<i64: 1, 128, 256>}]} {
    %c0 = arith.constant 0 : index
    %c0_0 = arith.constant 0 : index
    %c0_1 = arith.constant 0 : index
    %0 = vector.load %arg2[%c0, %c0_0, %c0_1] : memref<1x128x256xf32, #tpu.memory_space<vmem>>, vector<1x128x256xf32>
    %1 = vector.shape_cast %0 : vector<1x128x256xf32> to vector<128x256xf32>
    %cst = arith.constant dense<0.000000e+00> : vector<128x128xf32>
    %2 = tpu.matmul %1, %1, %cst {dimension_numbers = #tpu.dot_dimension_numbers<[1], [1], [0], [0], [0, 0, 1, 0], [], []>} : vector<128x256xf32>, vector<128x256xf32>, vector<128x128xf32> -> vector<128x128xf32>
    %c0_2 = arith.constant 0 : index
    %3 = memref.load %arg1[%c0_2] : memref<1xf32, #tpu.memory_space<smem>>
    %4 = tpu.iota {dimensions = array<i32: 1>} : vector<128x128xi32>
    %c4_i32 = arith.constant 4 : i32
    %5 = vector.broadcast %c4_i32 : i32 to vector<128x128xi32>
    %6 = arith.cmpi slt, %4, %5 : vector<128x128xi32>
    %cst_3 = arith.constant 0x7F800000 : f32
    %7 = vector.broadcast %cst_3 : f32 to vector<128x128xf32>
    %8 = arith.select %6, %2, %7 : vector<128x128xi1>, vector<128x128xf32>
    %cst_4 = arith.constant dense<0x7F800000> : vector<128xf32>
    %9 = vector.multi_reduction <minimumf>, %8, %cst_4 [1] : vector<128x128xf32> to vector<128xf32>
    %10 = vector.shape_cast %9 : vector<128xf32> to vector<128x1xf32>
    %11 = vector.broadcast %10 : vector<128x1xf32> to vector<128x128xf32>
    %12 = arith.subf %11, %2 : vector<128x128xf32>
    %cst_5 = arith.constant 0xFF800000 : f32
    %13 = vector.broadcast %cst_5 : f32 to vector<128x128xf32>
    %14 = arith.select %6, %12, %13 : vector<128x128xi1>, vector<128x128xf32>
    %15 = math.exp %14 : vector<128x128xf32>
    %cst_6 = arith.constant dense<0.000000e+00> : vector<128xf32>
    %16 = vector.multi_reduction <add>, %15, %cst_6 [1] : vector<128x128xf32> to vector<128xf32>
    %17 = vector.shape_cast %16 : vector<128xf32> to vector<128x1xf32>
    %18 = tpu.reciprocal %17 : vector<128x1xf32> -> vector<128x1xf32>
    %19 = vector.broadcast %3 : f32 to vector<128x1xf32>
    %20 = arith.mulf %19, %18 : vector<128x1xf32>
    %21 = vector.broadcast %20 : vector<128x1xf32> to vector<128x128xf32>
    %22 = arith.mulf %15, %21 : vector<128x128xf32>
    %cst_7 = arith.constant dense<0.000000e+00> : vector<128x256xf32>
    %23 = tpu.matmul %22, %1, %cst_7 {dimension_numbers = #tpu.dot_dimension_numbers<[1], [0], [0], [1], [0, 0, 1, 1], [], []>} : vector<128x128xf32>, vector<128x256xf32>, vector<128x256xf32> -> vector<128x256xf32>
    %24 = arith.addf %23, %1 : vector<128x256xf32>
    %c0_8 = arith.constant 0 : index
    %c0_9 = arith.constant 0 : index
    %c0_10 = arith.constant 0 : index
    %25 = vector.load %arg3[%c0_8, %c0_9, %c0_10] : memref<1x128x256xf32, #tpu.memory_space<vmem>>, vector<1x128x256xf32>
    %26 = vector.shape_cast %25 : vector<1x128x256xf32> to vector<128x256xf32>
    %27 = vector.shape_cast %24 : vector<128x256xf32> to vector<1x128x256xf32>
    tpu.vector_store %arg3[%c0_8, %c0_9, %c0_10], %27 {strides = array<i32>} : memref<1x128x256xf32, #tpu.memory_space<vmem>>, vector<1x128x256xf32>,
    return
  }
  func.func @transform_0(%arg0: i32, %arg1: memref<1xf32, #tpu.memory_space<smem>>) -> (i32, i32, i32) {
    %c0_i32 = arith.constant 0 : i32
    %c0_i32_0 = arith.constant 0 : i32
    %c0_i32_1 = arith.constant 0 : i32
    return %arg0, %c0_i32, %c0_i32_0 : i32, i32, i32
  }
  func.func @transform_1(%arg0: i32, %arg1: memref<1xf32, #tpu.memory_space<smem>>) -> (i32, i32, i32) {
    %c0_i32 = arith.constant 0 : i32
    %c0_i32_0 = arith.constant 0 : i32
    %c0_i32_1 = arith.constant 0 : i32
    return %arg0, %c0_i32, %c0_i32_0 : i32, i32, i32
  }
}

</mosaic_0001>

<bundles_post_ra>
// kernel: tpu_custom_call.1
= control target key start
LH: loop header
LB: loop body
LE: loop exit
PB: predicated region body
PF: predicated region fallthrough
CT: control target
= control target key end

     0   :  { %s1733_s0 = inlined_call_operand.<no memory space> [shape: f32[1], index: 0, kind: input, shape index: {}]   ;;  %s1734_s1 = inlined_call_operand.hbm [shape: f32[2,128,256], index: 1, kind: input, shape index: {}]   ;;  %s1735_s2 = inlined_call_operand.hbm [shape: f32[2,128,256], index: 2, kind: output, shape index: {}]  }
   0x1   :  { %7 = sst [smem:[#allocation3]] %s1733_s0 }
   0x2   :  { %8 = vsyncpa [#allocation5], 0 }
   0x3   :  { %10 = vsyncpa [#allocation5 + $0x1], 0 }
   0x4   :  { %11 = vsyncpa [#allocation6], 0 }
   0x5   :  { %13 = vsyncpa [#allocation6 + $0x1], 0  ;;  %s1109_s11 = smov 0   ;;  %s1111_s12 = smov 0  }
   0x6   :  { %s1113_s13 = smov 0   ;;  %s1115_s14 = smov 0  }
   0x7 LB: > { %s1130_s0 = sadd.s32 4294967295, %s1082_s14   ;;  %s791_s15 = sadd.s32 4294967294, %s1082_s14   ;;  %s1082_s14 = sphi %s1115_s14, %s1748_s14   ;;  %s1078_s13 = sphi %s1113_s13, %s1747_s13   ;;  %s1074_s12 = sphi %s1111_s12, %s1746_s12   ;;  %s1070_s11 = sphi %s1109_s11, %s1745_s11  }
   0x8   : > { %s1134_s16 = sadd.s32 1, %s1082_s14   ;;  %s26_s17 = sadd.s32 1, %s1078_s13 }
   0x9   : > { %s23_s18 = ssub.s32 %s1082_s14, %s1134_s16  ;;  %p33_p0 = scmp.ne.s32.totalorder %s1078_s13, %s1074_s12 }
   0xa   : > { %p24_p1 = scmp.eq.s32.totalorder %s23_s18, 0  ;;  %p34_p2 = scmp.eq.s32.totalorder %s1082_s14, 0 }
   0xb   : > { %p39_p3 = scmp.ne.s32.totalorder %s1074_s12, %s1070_s11  ;;  %p40_p4 = scmp.eq.s32.totalorder %s1130_s0, 0 }
   0xc   : > { %s1146_s19 = scalar_select %p24_p1, %s1078_s13, %s26_s17  }
   0xd   : > { %p1148_p5 = por %p34_p2, %p33_p0  ;;  %p1152_p6 = por %p40_p4, %p39_p3 }
   0xe   : > { %p63_p7 = scmp.eq.s32.totalorder %s1130_s0, 1  ;;  %p69_p8 = scmp.eq.s32.totalorder %s791_s15, 1 }
   0xf   : > { %p883_p10 = scmp.lt.s32.totalorder %s1082_s14, 2  ;;  %s89_s24 = sand.u32 1, %s1078_s13  }
  0x10   : > { %p1159_p11 = por %p63_p7, %p33_p0  ;;  %p1163_p12 = por %p69_p8, %p39_p3 }
  0x11   : > { %s805_s25 = sshll.u32 %s1082_s14, 12  ;;  %s794_s26 = sshll.u32 %s89_s24, 8 }
  0x12   : > { %s1739_s22 = scalar_select %p1159_p11, 1, 0 }
  0x13   : > { %s1740_s23 = scalar_select %p1163_p12, 1, 0 }
  0x14   : > { %s1172_s29 = scalar_lea.hbm %s1734_s1, %s805_s25  ;;  %s93_s30 = scalar_lea.vmem [#allocation4], %s794_s26 }
  0x15   : > { %s100_s3 = sshll.u32 %s93_s30, 4  ;;  %p1176_p13 = pnand %p883_p10, %p1148_p5  ;;  %s1180_s3 = int_to_ptr.vmem [resolvable:$true] %s100_s3 }
  0x16   : > { %s1182_s5 = scalar_lea.sflag [#allocation5], %s89_s24  ;;  %s986_s6 = scalar_lea.hbm %s1172_s29, 4096 }
  0x17   : > { %p987_p0 = scmp.ne.s32.totalorder %s1172_s29, %s986_s6  ;;  %p988_p1 = pneg %p1176_p13 }
  0x18   : > { %s991_s9 = scalar_lea.hbm %s1734_s1, 8192  ;;  %p992_p4 = scmp.lt.u32.totalorder %s1172_s29, %s1734_s1 }
  0x19   : > { %p989_p2 = pnand %p988_p1, %p987_p0  ;;  %p993_p5 = scmp.lt.u32.totalorder %s991_s9, %s986_s6 }
  0x1a   : > { %p995_p8 = scmp.lt.u32.totalorder %s986_s6, %s1172_s29 }
  0x1b   : > { %p990_p3 = pneg %p989_p2  ;;  %p994_p7 = por %p993_p5, %p992_p4 }
  0x1d   : > { %p996_p10 = por %p995_p8, %p994_p7 }
  0x1f   : > { %p997_p9 = pnand %p996_p10, %p990_p3 }
  0x21   : > { %1000 = shalt.err (!%p997_p9)
}
  0x22   : > { %s1001_s17 = scalar_lea.vmem %s1180_s3, 4096  ;;  %s1084_s18 = smov [#allocation4]  }
  0x23   : > { %p1002_p0 = scmp.ne.s32.totalorder %s1180_s3, %s1001_s17  ;;  %s1006_s20 = sshll.u32 %s1084_s18, 4  ;;  %s1007_s20 = int_to_ptr.vmem [resolvable:$false] %s1006_s20 }
  0x24   : > { %s1008_s24 = scalar_lea.vmem %s1007_s20, 8192  ;;  %p1009_p11 = scmp.lt.s32.totalorder %s1180_s3, %s1007_s20 }
  0x25   : > { %p1004_p2 = pnand %p1002_p0, %p988_p1  ;;  %p1010_p4 = scmp.lt.s32.totalorder %s1008_s24, %s1001_s17 }
  0x27   : > { %p1005_p12 = pneg %p1004_p2  ;;  %p1011_p5 = por %p1010_p4, %p1009_p11 }
  0x29   : > { %p1012_p7 = pnand %p1011_p5, %p1005_p12 }
  0x2b   : > { %1015 = shalt.err (!%p1012_p7)
}
  0x2c   : > { %s1085_s25 = smov 256   ;;  %s1086_s26 = smov 16  }
  0x2d   : > { %878 = dma.hbm_to_vmem [thread:$0]  (!%p1176_p13), %s1172_s29, 4096, %s1180_s3, %s1182_s5, %s1085_s25, %s1085_s25, %s1086_s26  }
  0x2e   : > { %p797_p9 = scmp.ge.s32.totalorder %s1082_s14, 1  ;;  %p108_p1 = scmp.lt.s32.totalorder %s1082_s14, 3 }
  0x30   : > { %p109_p3 = pnand %p797_p9, %p108_p1 }
  0x31   : > { %s1213_s27 = sand.u32 (!%p109_p3), 1, %s1074_s12  }
  0x32   : > { %112 = sbr.rel (%p109_p3) target bundleno = 943 (0x3af), region = 24  ;;  %s798_s28 = sshll.u32 (!%p109_p3), %s1213_s27, 8 }
  0x33   : > { %s115_s30 = scalar_lea.sflag (!%p109_p3), [#allocation5], %s1213_s27  ;;  %s1219_s6 = scalar_lea.vmem (!%p109_p3), [#allocation4], %s798_s28 }
  0x39   : > { %1061 = dma.done.wait (%p1152_p6), %s115_s30, 4096  }
  0x3a   : > { %1063 = vsyncadd (%p1152_p6), %s115_s30, 4294963200  ;;  %v1226_v0 = vld [vmem:[%s1219_s6 + $0x8] sm:$0xff]  ;;  %v1229_v1 = vld [vmem:[%s1219_s6 + $0x18] sm:$0xff]  ;;  %v315_v48 = vlaneseq  ;;  %s314_s21 = sld [smem:[#allocation3]]  ;;  %s1618_s29 = scalar_lea.vmem [#allocation7], %s798_s28 }
  0x3b   : > { %v1232_v2 = vld [vmem:[%s1219_s6] sm:$0xff]  ;;  %v807_v3 = vpack.c.bf16 %v1229_v1, %v1226_v0  ;;  %v1237_v4 = vld [vmem:[%s1219_s6 + $0x10] sm:$0xff]  ;;  %v1240_v5 = vld [vmem:[%s1219_s6 + $0x28] sm:$0xff]  ;;  %233 = vmatprep.mubr.f32.mxu0 %v1226_v0  ;;  %s806_s3 = sshll.u32 %s1130_s0, 12  ;;  %s718_s4 = sshll.u32 %s1618_s29, 4  ;;  %s1686_s4 = int_to_ptr.vmem [resolvable:$true] %s718_s4 }
  0x3c   : > { %v1243_v6 = vld [vmem:[%s1219_s6 + $0x38] sm:$0xff]  ;;  %v809_v7 = vpack.c.bf16 %v1237_v4, %v1232_v2  ;;  %v1251_v9 = vld [vmem:[%s1219_s6 + $0x20] sm:$0xff]  ;;  %v1254_v10 = vld [vmem:[%s1219_s6 + $0x30] sm:$0xff]  ;;  %v1385_v49 = vand.u32 127, %v315_v48  ;;  %s1684_s8 = scalar_lea.hbm %s1735_s2, %s806_s3  ;;  %s705_s0 = scalar_lea.sflag [#allocation6], %s1213_s27 }
  0x3d   : > { %v811_v8 = vpack.c.bf16 %v1243_v6, %v1240_v5  ;;  %808 = vmatprep.subr.bf16.mxu0 %v807_v3  ;;  %840 = vmatprep.subr.bf16.mxu1 %v807_v3  ;;  %v1257_v11 = vld [vmem:[%s1219_s6 + $0x48] sm:$0xff]  ;;  %v1260_v12 = vld [vmem:[%s1219_s6 + $0x58] sm:$0xff]  ;;  %v813_v13 = vpack.c.bf16 %v1254_v10, %v1251_v9  ;;  %v1267_v15 = vld [vmem:[%s1219_s6 + $0x40] sm:$0xff]  ;;  %s1016_s9 = scalar_lea.vmem %s1686_s4, 4096  ;;  %p1742_p11 = scmp.ne.s32.totalorder %s1739_s22, 0 }
  0x3e   : > { %810 = vmatpush1.bf16.xpose.msra.mxu0 %v809_v7  ;;  %842 = vmatpush1.bf16.msra.mxu1 %v809_v7  ;;  %v815_v14 = vpack.c.bf16 %v1260_v12, %v1257_v11  ;;  %v1270_v16 = vld [vmem:[%s1219_s6 + $0x50] sm:$0xff]  ;;  %v1273_v17 = vld [vmem:[%s1219_s6 + $0x68] sm:$0xff]  ;;  %v1276_v18 = vld [vmem:[%s1219_s6 + $0x78] sm:$0xff]  ;;  %vm317_vm0 = vcmp.lt.s32.totalorder %v1385_v49, 4  ;;  %p1017_p6 = scmp.ne.s32.totalorder %s1686_s4, %s1016_s9  ;;  %s1088_s10 = smov [#allocation7]  }
  0x3f   : > { %812 = vmatprep.subr.bf16.mxu0 %v811_v8  ;;  %844 = vmatprep.subr.bf16.mxu1 %v811_v8  ;;  %v817_v19 = vpack.c.bf16 %v1270_v16, %v1267_v15  ;;  %v819_v20 = vpack.c.bf16 %v1276_v18, %v1273_v17  ;;  %v1283_v21 = vld [vmem:[%s1219_s6 + $0x60] sm:$0xff]  ;;  %v1286_v22 = vld [vmem:[%s1219_s6 + $0x70] sm:$0xff]  ;;  %v1289_v23 = vld [vmem:[%s1219_s6 + $0x88] sm:$0xff]  ;;  %s1020_s15 = sshll.u32 %s1088_s10, 4  ;;  %s1021_s15 = int_to_ptr.vmem [resolvable:$false] %s1020_s15 }
  0x40   : > { %v1292_v24 = vld [vmem:[%s1219_s6 + $0x98] sm:$0xff]  ;;  %v821_v25 = vpack.c.bf16 %v1286_v22, %v1283_v21  ;;  %v1299_v27 = vld [vmem:[%s1219_s6 + $0x80] sm:$0xff]  ;;  %v1302_v28 = vld [vmem:[%s1219_s6 + $0x90] sm:$0xff]  ;;  %p1018_p12 = pnand %p1017_p6, %p1742_p11  ;;  %s1022_s17 = scalar_lea.vmem %s1021_s15, 8192 }
  0x41   : > { %v823_v26 = vpack.c.bf16 %v1292_v24, %v1289_v23  ;;  %v1305_v29 = vld [vmem:[%s1219_s6 + $0xa8] sm:$0xff]  ;;  %v1308_v30 = vld [vmem:[%s1219_s6 + $0xb8] sm:$0xff]  ;;  %v825_v31 = vpack.c.bf16 %v1302_v28, %v1299_v27  ;;  %v1315_v33 = vld [vmem:[%s1219_s6 + $0xa0] sm:$0xff]  ;;  %p1023_p8 = scmp.lt.s32.totalorder %s1686_s4, %s1021_s15  ;;  %p1024_p10 = scmp.lt.s32.totalorder %s1022_s17, %s1016_s9 }
  0x42   : > { %846 = vmatpush1.bf16.msra.mxu1 %v813_v13  ;;  %v827_v32 = vpack.c.bf16 %v1308_v30, %v1305_v29  ;;  %v1318_v34 = vld [vmem:[%s1219_s6 + $0xb0] sm:$0xff]  ;;  %v1321_v35 = vld [vmem:[%s1219_s6 + $0xc8] sm:$0xff]  ;;  %v1324_v36 = vld [vmem:[%s1219_s6 + $0xd8] sm:$0xff]  ;;  %p1019_p13 = pneg %p1018_p12 }
  0x43   : > { %848 = vmatprep.subr.bf16.mxu1 %v815_v14  ;;  %v829_v37 = vpack.c.bf16 %v1318_v34, %v1315_v33  ;;  %v831_v38 = vpack.c.bf16 %v1324_v36, %v1321_v35  ;;  %v1331_v39 = vld [vmem:[%s1219_s6 + $0xc0] sm:$0xff]  ;;  %v1334_v40 = vld [vmem:[%s1219_s6 + $0xd0] sm:$0xff]  ;;  %v1337_v41 = vld [vmem:[%s1219_s6 + $0xe8] sm:$0xff]  ;;  %p1025_p0 = por %p1024_p10, %p1023_p8 }
  0x44   : > { %v1340_v42 = vld [vmem:[%s1219_s6 + $0xf8] sm:$0xff]  ;;  %v833_v43 = vpack.c.bf16 %v1334_v40, %v1331_v39  ;;  %v1347_v45 = vld [vmem:[%s1219_s6 + $0xe0] sm:$0xff]  ;;  %v1350_v46 = vld [vmem:[%s1219_s6 + $0xf0] sm:$0xff] }
  0x45   : > { %v835_v44 = vpack.c.bf16 %v1340_v42, %v1337_v41  ;;  %v837_v47 = vpack.c.bf16 %v1350_v46, %v1347_v45  ;;  %p1026_p2 = pnand %p1025_p0, %p1019_p13 }
  0x46   : > { %814 = vmatpush1.bf16.xpose.msra.mxu0 %v813_v13  ;;  %850 = vmatpush1.bf16.msra.mxu1 %v817_v19 }
  0x47   : > { %816 = vmatprep.subr.bf16.mxu0 %v815_v14  ;;  %852 = vmatprep.subr.bf16.mxu1 %v819_v20 }
  0x4a   : > { %854 = vmatpush1.bf16.msra.mxu1 %v821_v25 }
  0x4b   : > { %856 = vmatprep.subr.bf16.mxu1 %v823_v26 }
  0x4e   : > { %818 = vmatpush1.bf16.xpose.msra.mxu0 %v817_v19  ;;  %858 = vmatpush1.bf16.msra.mxu1 %v825_v31 }
  0x4f   : > { %820 = vmatprep.subr.bf16.mxu0 %v819_v20  ;;  %860 = vmatprep.subr.bf16.mxu1 %v827_v32 }
  0x52   : > { %862 = vmatpush1.bf16.msra.mxu1 %v829_v37 }
  0x53   : > { %864 = vmatprep.subr.bf16.mxu1 %v831_v38 }
  0x56   : > { %822 = vmatpush1.bf16.xpose.msra.mxu0 %v821_v25  ;;  %866 = vmatpush1.bf16.msra.mxu1 %v833_v43 }
  0x57   : > { %824 = vmatprep.subr.bf16.mxu0 %v823_v26  ;;  %868 = vmatprep.subr.bf16.mxu1 %v835_v44 }
  0x5a   : > { %870 = vmatpush1.bf16.msra.mxu1 %v837_v47 }
  0x5e   : > { %826 = vmatpush1.bf16.xpose.msra.mxu0 %v825_v31 }
  0x5f   : > { %828 = vmatprep.subr.bf16.mxu0 %v827_v32 }
  0x66   : > { %830 = vmatpush1.bf16.xpose.msra.mxu0 %v829_v37 }
  0x67   : > { %832 = vmatprep.subr.bf16.mxu0 %v831_v38 }
  0x6e   : > { %834 = vmatpush1.bf16.xpose.msra.mxu0 %v833_v43 }
  0x6f   : > { %836 = vmatprep.subr.bf16.mxu0 %v835_v44 }
  0x76   : > { %838 = vmatpush1.bf16.xpose.msra.mxu0 %v837_v47 }
  0x7d   : > { %234 = vmatmul.mubr.f32.vlgmr.msra.gmra.mrb[0].mxu0 %v1232_v2 }
  0x7e   : > { %238 = vmatprep.mubr.f32.mxu0 %v1229_v1 }
  0x81   : > { %239 = vmatmul.mubr.f32.gmra.mrb[2].mxu0 %v1237_v4 }
  0x82   : > { %243 = vmatprep.mubr.f32.mxu0 %v1240_v5 }
  0x85   : > { %244 = vmatmul.mubr.f32.gmra.mrb[4].mxu0 %v1251_v9 }
  0x86   : > { %248 = vmatprep.mubr.f32.mxu0 %v1243_v6 }
  0x89   : > { %249 = vmatmul.mubr.f32.gmra.mrb[6].mxu0 %v1254_v10 }
  0x8a   : > { %253 = vmatprep.mubr.f32.mxu0 %v1257_v11 }
  0x8d   : > { %254 = vmatmul.mubr.f32.gmra.mrb[8].mxu0 %v1267_v15 }
  0x8e   : > { %258 = vmatprep.mubr.f32.mxu0 %v1260_v12 }
  0x91   : > { %259 = vmatmul.mubr.f32.gmra.mrb[10].mxu0 %v1270_v16 }
  0x92   : > { %263 = vmatprep.mubr.f32.mxu0 %v1273_v17 }
  0x95   : > { %264 = vmatmul.mubr.f32.gmra.mrb[12].mxu0 %v1283_v21 }
  0x96   : > { %268 = vmatprep.mubr.f32.mxu0 %v1276_v18 }
  0x99   : > { %269 = vmatmul.mubr.f32.gmra.mrb[14].mxu0 %v1286_v22 }
  0x9a   : > { %273 = vmatprep.mubr.f32.mxu0 %v1289_v23 }
  0x9d   : > { %274 = vmatmul.mubr.f32.gmra.mrb[16].mxu0 %v1299_v27 }
  0x9e   : > { %278 = vmatprep.mubr.f32.mxu0 %v1292_v24 }
  0xa1   : > { %279 = vmatmul.mubr.f32.gmra.mrb[18].mxu0 %v1302_v28 }
  0xa2   : > { %283 = vmatprep.mubr.f32.mxu0 %v1305_v29 }
  0xa5   : > { %284 = vmatmul.mubr.f32.gmra.mrb[20].mxu0 %v1315_v33 }
  0xa6   : > { %288 = vmatprep.mubr.f32.mxu0 %v1308_v30 }
  0xa9   : > { %289 = vmatmul.mubr.f32.gmra.mrb[22].mxu0 %v1318_v34 }
  0xaa   : > { %293 = vmatprep.mubr.f32.mxu0 %v1321_v35 }
  0xad   : > { %294 = vmatmul.mubr.f32.gmra.mrb[24].mxu0 %v1331_v39 }
  0xae   : > { %298 = vmatprep.mubr.f32.mxu0 %v1324_v36 }
  0xb1   : > { %299 = vmatmul.mubr.f32.gmra.mrb[26].mxu0 %v1334_v40 }
  0xb2   : > { %303 = vmatprep.mubr.f32.mxu0 %v1337_v41 }
  0xb5   : > { %304 = vmatmul.mubr.f32.gmra.mrb[28].mxu0 %v1347_v45 }
  0xb6   : > { %308 = vmatprep.mubr.f32.mxu0 %v1340_v42 }
  0xb9   : > { %309 = vmatmul.mubr.f32.gmra.mrb[30].mxu0 %v1350_v46 }
 0x150   : > { %v1388_v50 = vpop.f32.mrb[0].mxu0 }
 0x151   : > { %v237_v51 = vpop.f32.mrb[1].mxu0  ;;  %v318_v52 = vsel %vm317_vm0, %v1388_v50, inf }
 0x152   : > { %334 = vmin.xlane.f32.xlu0 %v318_v52 }
 0x154   : > { %v1393_v53 = vpop.f32.mrb[2].mxu0 }
 0x155   : > { %v242_v54 = vpop.f32.mrb[3].mxu0  ;;  %v319_v55 = vsel %vm317_vm0, %v1393_v53, inf }
 0x156   : > { %336 = vmin.xlane.f32.xlu0 %v319_v55 }
 0x158   : > { %v1398_v56 = vpop.f32.mrb[4].mxu0 }
 0x159   : > { %v247_v57 = vpop.f32.mrb[5].mxu0  ;;  %v320_v58 = vsel %vm317_vm0, %v1398_v56, inf }
 0x15a   : > { %338 = vmin.xlane.f32.xlu1 %v320_v58 }
 0x15c   : > { %v1403_v59 = vpop.f32.mrb[6].mxu0 }
 0x15d   : > { %v252_v60 = vpop.f32.mrb[7].mxu0  ;;  %v321_v61 = vsel %vm317_vm0, %v1403_v59, inf }
 0x15e   : > { %340 = vmin.xlane.f32.xlu1 %v321_v61 }
 0x160   : > { %v1408_v62 = vpop.f32.mrb[8].mxu0 }
 0x161   : > { %v257_v63 = vpop.f32.mrb[9].mxu0  ;;  %v322_v3 = vsel %vm317_vm0, %v1408_v62, inf }
 0x162   : > { %342 = vmin.xlane.f32.xlu0 %v322_v3 }
 0x164   : > { %v1413_v7 = vpop.f32.mrb[10].mxu0 }
 0x165   : > { %v262_v8 = vpop.f32.mrb[11].mxu0  ;;  %v323_v13 = vsel %vm317_vm0, %v1413_v7, inf }
 0x166   : > { %344 = vmin.xlane.f32.xlu1 %v323_v13 }
 0x168   : > { %v1418_v14 = vpop.f32.mrb[12].mxu0 }
 0x169   : > { %v267_v19 = vpop.f32.mrb[13].mxu0  ;;  %v324_v20 = vsel %vm317_vm0, %v1418_v14, inf }
 0x16a   : > { %346 = vmin.xlane.f32.xlu0 %v324_v20 }
 0x16c   : > { %v1423_v25 = vpop.f32.mrb[14].mxu0 }
 0x16d   : > { %v272_v26 = vpop.f32.mrb[15].mxu0  ;;  %v325_v31 = vsel %vm317_vm0, %v1423_v25, inf }
 0x16e   : > { %348 = vmin.xlane.f32.xlu1 %v325_v31 }
 0x170   : > { %v1428_v32 = vpop.f32.mrb[16].mxu0 }
 0x171   : > { %v277_v37 = vpop.f32.mrb[17].mxu0  ;;  %v326_v38 = vsel %vm317_vm0, %v1428_v32, inf }
 0x172   : > { %350 = vmin.xlane.f32.xlu0 %v326_v38 }
 0x174   : > { %v1433_v43 = vpop.f32.mrb[18].mxu0 }
 0x175   : > { %v282_v44 = vpop.f32.mrb[19].mxu0  ;;  %v327_v47 = vsel %vm317_vm0, %v1433_v43, inf }
 0x176   : > { %352 = vmin.xlane.f32.xlu1 %v327_v47 }
 0x178   : > { %v1438_v48 = vpop.f32.mrb[20].mxu0 }
 0x179   : > { %v287_v51 = vpop.f32.mrb[21].mxu0  ;;  %v328_v52 = vsel %vm317_vm0, %v1438_v48, inf }
 0x17a   : > { %354 = vmin.xlane.f32.xlu0 %v328_v52 }
 0x17c   : > { %v1443_v54 = vpop.f32.mrb[22].mxu0 }
 0x17d   : > { %v292_v55 = vpop.f32.mrb[23].mxu0  ;;  %v329_v57 = vsel %vm317_vm0, %v1443_v54, inf }
 0x17e   : > { %356 = vmin.xlane.f32.xlu1 %v329_v57 }
 0x180   : > { %v1448_v58 = vpop.f32.mrb[24].mxu0 }
 0x181   : > { %v297_v60 = vpop.f32.mrb[25].mxu0  ;;  %v330_v61 = vsel %vm317_vm0, %v1448_v58, inf }
 0x182   : > { %358 = vmin.xlane.f32.xlu0 %v330_v61 }
 0x184   : > { %v1453_v63 = vpop.f32.mrb[26].mxu0 }
 0x185   : > { %v302_v3 = vpop.f32.mrb[27].mxu0  ;;  %v331_v8 = vsel %vm317_vm0, %v1453_v63, inf }
 0x186   : > { %360 = vmin.xlane.f32.xlu1 %v331_v8 }
 0x188   : > { %v1458_v13 = vpop.f32.mrb[28].mxu0 }
 0x189   : > { %v307_v19 = vpop.f32.mrb[29].mxu0  ;;  %v332_v20 = vsel %vm317_vm0, %v1458_v13, inf }
 0x18a   : > { %362 = vmin.xlane.f32.xlu0 %v332_v20 }
 0x18c   : > { %v1463_v26 = vpop.f32.mrb[30].mxu0 }
 0x18d   : > { %v312_v31 = vpop.f32.mrb[31].mxu0  ;;  %v333_v37 = vsel %vm317_vm0, %v1463_v26, inf }
 0x18e   : > { %364 = vmin.xlane.f32.xlu1 %v333_v37 }
 0x1df   : > { %v335_v38 = vpop.xlane.xlu0 %334 }
 0x1e0   : > { %v366_v44 = vsub.f32 %v335_v38, %v1388_v50 }
 0x1e2   : > { %v382_v47 = vsel %vm317_vm0, %v366_v44, -inf }
 0x1e3   : > { %v398_v51 = vmul.f32 1.442695, %v382_v47  ;;  %v337_v52 = vpop.xlane.xlu0 %336 }
 0x1e4   : > { %v367_v55 = vsub.f32 %v337_v52, %v1393_v53 }
 0x1e5   : > { %922 = vpow2.f32 %v398_v51 }
 0x1e6   : > { %v383_v57 = vsel %vm317_vm0, %v367_v55, -inf }
 0x1e7   : > { %v400_v60 = vmul.f32 1.442695, %v383_v57  ;;  %v339_v61 = vpop.xlane.xlu1 %338 }
 0x1e8   : > { %v368_v3 = vsub.f32 %v339_v61, %v1398_v56 }
 0x1e9   : > { %924 = vpow2.f32 %v400_v60 }
 0x1ea   : > { %v384_v8 = vsel %vm317_vm0, %v368_v3, -inf }
 0x1eb   : > { %v402_v50 = vmul.f32 1.442695, %v384_v8  ;;  %v341_v19 = vpop.xlane.xlu1 %340 }
 0x1ec   : > { %v369_v20 = vsub.f32 %v341_v19, %v1403_v59 }
 0x1ed   : > { %926 = vpow2.f32 %v402_v50 }
 0x1ee   : > { %v385_v53 = vsel %vm317_vm0, %v369_v20, -inf }
 0x1ef   : > { %v1480_v31 = vpop.eup %922  ;;  %v404_v37 = vmul.f32 1.442695, %v385_v53  ;;  %v343_v38 = vpop.xlane.xlu0 %342 }
 0x1f0   : > { %v370_v44 = vsub.f32 %v343_v38, %v1408_v62  ;;  %430 = vadd.xlane.f32.xlu0 %v1480_v31 }
 0x1f1   : > { %928 = vpow2.f32 %v404_v37 }
 0x1f2   : > { %v386_v56 = vsel %vm317_vm0, %v370_v44, -inf }
 0x1f3   : > { %v1486_v47 = vpop.eup %924  ;;  %v406_v51 = vmul.f32 1.442695, %v386_v56  ;;  %v345_v59 = vpop.xlane.xlu1 %344 }
 0x1f4   : > { %v371_v52 = vsub.f32 %v345_v59, %v1413_v7  ;;  %432 = vadd.xlane.f32.xlu1 %v1486_v47 }
 0x1f5   : > { %930 = vpow2.f32 %v406_v51 }
 0x1f6   : > { %v387_v55 = vsel %vm317_vm0, %v371_v52, -inf }
 0x1f7   : > { %v1492_v57 = vpop.eup %926  ;;  %v408_v62 = vmul.f32 1.442695, %v387_v55  ;;  %v347_v60 = vpop.xlane.xlu0 %346 }
 0x1f8   : > { %v372_v61 = vsub.f32 %v347_v60, %v1418_v14  ;;  %434 = vadd.xlane.f32.xlu0 %v1492_v57 }
 0x1f9   : > { %932 = vpow2.f32 %v408_v62 }
 0x1fa   : > { %v388_v3 = vsel %vm317_vm0, %v372_v61, -inf }
 0x1fb   : > { %v1498_v8 = vpop.eup %928  ;;  %v410_v7 = vmul.f32 1.442695, %v388_v3  ;;  %v349_v50 = vpop.xlane.xlu1 %348 }
 0x1fc   : > { %v373_v19 = vsub.f32 %v349_v50, %v1423_v25  ;;  %436 = vadd.xlane.f32.xlu1 %v1498_v8  ;;  %v1087_v50 = vmov 0.0  }
 0x1fd   : > { %934 = vpow2.f32 %v410_v7  ;;  %575 = vmatprep.mubr.f32.mxu1 %v1087_v50 }
 0x1fe   : > { %v389_v20 = vsel %vm317_vm0, %v373_v19, -inf }
 0x1ff   : > { %v1504_v53 = vpop.eup %930  ;;  %v412_v14 = vmul.f32 1.442695, %v389_v20  ;;  %v351_v37 = vpop.xlane.xlu0 %350 }
 0x200   : > { %v374_v38 = vsub.f32 %v351_v37, %v1428_v32  ;;  %438 = vadd.xlane.f32.xlu0 %v1504_v53 }
 0x201   : > { %936 = vpow2.f32 %v412_v14 }
 0x202   : > { %v390_v44 = vsel %vm317_vm0, %v374_v38, -inf }
 0x203   : > { %v1510_v56 = vpop.eup %932  ;;  %v414_v25 = vmul.f32 1.442695, %v390_v44  ;;  %v353_v51 = vpop.xlane.xlu1 %352 }
 0x204   : > { %v375_v59 = vsub.f32 %v353_v51, %v1433_v43  ;;  %440 = vadd.xlane.f32.xlu1 %v1510_v56 }
 0x205   : > { %938 = vpow2.f32 %v414_v25 }
 0x206   : > { %v391_v52 = vsel %vm317_vm0, %v375_v59, -inf }
 0x207   : > { %v1516_v55 = vpop.eup %934  ;;  %v416_v32 = vmul.f32 1.442695, %v391_v52  ;;  %v355_v62 = vpop.xlane.xlu0 %354 }
 0x208   : > { %v376_v60 = vsub.f32 %v355_v62, %v1438_v48  ;;  %442 = vadd.xlane.f32.xlu0 %v1516_v55 }
 0x209   : > { %940 = vpow2.f32 %v416_v32 }
 0x20a   : > { %v392_v61 = vsel %vm317_vm0, %v376_v60, -inf }
 0x20b   : > { %v1522_v3 = vpop.eup %936  ;;  %v418_v43 = vmul.f32 1.442695, %v392_v61  ;;  %v357_v7 = vpop.xlane.xlu1 %356 }
 0x20c   : > { %v377_v19 = vsub.f32 %v357_v7, %v1443_v54  ;;  %444 = vadd.xlane.f32.xlu1 %v1522_v3 }
 0x20d   : > { %942 = vpow2.f32 %v418_v43 }
 0x20e   : > { %v393_v48 = vsel %vm317_vm0, %v377_v19, -inf }
 0x20f   : > { %v1529_v20 = vpop.eup %938  ;;  %v420_v14 = vmul.f32 1.442695, %v393_v48  ;;  %v359_v37 = vpop.xlane.xlu0 %358 }
 0x210   : > { %v378_v38 = vsub.f32 %v359_v37, %v1448_v58  ;;  %446 = vadd.xlane.f32.xlu0 %v1529_v20 }
 0x211   : > { %944 = vpow2.f32 %v420_v14 }
 0x212   : > { %v394_v44 = vsel %vm317_vm0, %v378_v38, -inf }
 0x213   : > { %v1535_v25 = vpop.eup %940  ;;  %v422_v54 = vmul.f32 1.442695, %v394_v44  ;;  %v361_v51 = vpop.xlane.xlu1 %360 }
 0x214   : > { %v379_v59 = vsub.f32 %v361_v51, %v1453_v63  ;;  %448 = vadd.xlane.f32.xlu1 %v1535_v25  ;;  %v1565_v51 = vstv %s314_s21 }
 0x215   : > { %946 = vpow2.f32 %v422_v54 }
 0x216   : > { %v395_v52 = vsel %vm317_vm0, %v379_v59, -inf }
 0x217   : > { %v1541_v32 = vpop.eup %942  ;;  %v424_v58 = vmul.f32 1.442695, %v395_v52  ;;  %v363_v62 = vpop.xlane.xlu0 %362 }
 0x218   : > { %v380_v60 = vsub.f32 %v363_v62, %v1458_v13  ;;  %450 = vadd.xlane.f32.xlu0 %v1541_v32 }
 0x219   : > { %948 = vpow2.f32 %v424_v58 }
 0x21a   : > { %v396_v61 = vsel %vm317_vm0, %v380_v60, -inf }
 0x21b   : > { %v1547_v43 = vpop.eup %944  ;;  %v426_v63 = vmul.f32 1.442695, %v396_v61  ;;  %v365_v7 = vpop.xlane.xlu1 %364 }
 0x21c   : > { %v381_v19 = vsub.f32 %v365_v7, %v1463_v26  ;;  %452 = vadd.xlane.f32.xlu1 %v1547_v43 }
 0x21d   : > { %950 = vpow2.f32 %v426_v63 }
 0x21e   : > { %v397_v48 = vsel %vm317_vm0, %v381_v19, -inf }
 0x21f   : > { %v1553_v14 = vpop.eup %946  ;;  %v428_v13 = vmul.f32 1.442695, %v397_v48 }
 0x220   : > { %454 = vadd.xlane.f32.xlu0 %v1553_v14 }
 0x221   : > { %952 = vpow2.f32 %v428_v13 }
 0x223   : > { %v1556_v37 = vpop.eup %948 }
 0x224   : > { %456 = vadd.xlane.f32.xlu1 %v1556_v37 }
 0x227   : > { %v1559_v38 = vpop.eup %950 }
 0x228   : > { %458 = vadd.xlane.f32.xlu0 %v1559_v38 }
 0x22b   : > { %v1562_v26 = vpop.eup %952 }
 0x22c   : > { %460 = vadd.xlane.f32.xlu1 %v1562_v26 }
 0x27d   : > { %v431_v49 = vpop.xlane.xlu0 %430 }
 0x27e   : > { %954 = vrcp.f32 %v431_v49 }
 0x281   : > { %v433_v44 = vpop.xlane.xlu1 %432 }
 0x282   : > { %956 = vrcp.f32 %v433_v44 }
 0x285   : > { %v435_v54 = vpop.xlane.xlu0 %434 }
 0x286   : > { %958 = vrcp.f32 %v435_v54 }
 0x288   : > { %v955_v59 = vpop.eup %954 }
 0x289   : > { %v437_v52 = vpop.xlane.xlu1 %436  ;;  %v479_v58 = vmul.f32 %v955_v59, %v1565_v51 }
 0x28a   : > { %960 = vrcp.f32 %v437_v52 }
 0x28b   : > { %v495_v62 = vmul.f32 %v1480_v31, %v479_v58 }
 0x28c   : > { %v957_v60 = vpop.eup %956 }
 0x28d   : > { %576 = vmatmul.mubr.f32.vlgmr.msra.gmra.mrb[0].mxu1 %v495_v62  ;;  %v439_v61 = vpop.xlane.xlu0 %438  ;;  %v480_v63 = vmul.f32 %v957_v60, %v1565_v51 }
 0x28e   : > { %962 = vrcp.f32 %v439_v61  ;;  %581 = vmatprep.mubr.f32.mxu1 %v1087_v50 }
 0x28f   : > { %v496_v7 = vmul.f32 %v1486_v47, %v480_v63 }
 0x290   : > { %v959_v19 = vpop.eup %958 }
 0x291   : > { %582 = vmatmul.mubr.f32.gmra.mrb[2].mxu1 %v496_v7  ;;  %v441_v48 = vpop.xlane.xlu1 %440  ;;  %v481_v13 = vmul.f32 %v959_v19, %v1565_v51 }
 0x292   : > { %964 = vrcp.f32 %v441_v48  ;;  %587 = vmatprep.mubr.f32.mxu1 %v1087_v50 }
 0x293   : > { %v497_v31 = vmul.f32 %v1492_v57, %v481_v13 }
 0x294   : > { %v961_v49 = vpop.eup %960 }
 0x295   : > { %v443_v44 = vpop.xlane.xlu0 %442  ;;  %588 = vmatmul.mubr.f32.gmra.mrb[4].mxu1 %v497_v31  ;;  %v482_v54 = vmul.f32 %v961_v49, %v1565_v51 }
 0x296   : > { %966 = vrcp.f32 %v443_v44  ;;  %593 = vmatprep.mubr.f32.mxu1 %v1087_v50 }
 0x297   : > { %v498_v47 = vmul.f32 %v1498_v8, %v482_v54 }
 0x298   : > { %v963_v59 = vpop.eup %962 }
 0x299   : > { %594 = vmatmul.mubr.f32.gmra.mrb[6].mxu1 %v498_v47  ;;  %v445_v52 = vpop.xlane.xlu1 %444  ;;  %v483_v58 = vmul.f32 %v963_v59, %v1565_v51 }
 0x29a   : > { %968 = vrcp.f32 %v445_v52  ;;  %599 = vmatprep.mubr.f32.mxu1 %v1087_v50 }
 0x29b   : > { %v499_v57 = vmul.f32 %v1504_v53, %v483_v58 }
 0x29c   : > { %v965_v62 = vpop.eup %964 }
 0x29d   : > { %v447_v60 = vpop.xlane.xlu0 %446  ;;  %600 = vmatmul.mubr.f32.gmra.mrb[8].mxu1 %v499_v57  ;;  %v484_v61 = vmul.f32 %v965_v62, %v1565_v51 }
 0x29e   : > { %970 = vrcp.f32 %v447_v60  ;;  %605 = vmatprep.mubr.f32.mxu1 %v1087_v50 }
 0x29f   : > { %v500_v8 = vmul.f32 %v1510_v56, %v484_v61 }
 0x2a0   : > { %v967_v63 = vpop.eup %966 }
 0x2a1   : > { %606 = vmatmul.mubr.f32.gmra.mrb[10].mxu1 %v500_v8  ;;  %v449_v7 = vpop.xlane.xlu1 %448  ;;  %v485_v19 = vmul.f32 %v967_v63, %v1565_v51 }
 0x2a2   : > { %972 = vrcp.f32 %v449_v7  ;;  %611 = vmatprep.mubr.f32.mxu1 %v1087_v50 }
 0x2a3   : > { %v501_v53 = vmul.f32 %v1516_v55, %v485_v19 }
 0x2a4   : > { %v969_v48 = vpop.eup %968 }
 0x2a5   : > { %v451_v13 = vpop.xlane.xlu0 %450  ;;  %612 = vmatmul.mubr.f32.gmra.mrb[12].mxu1 %v501_v53  ;;  %v486_v31 = vmul.f32 %v969_v48, %v1565_v51 }
 0x2a6   : > { %974 = vrcp.f32 %v451_v13  ;;  %617 = vmatprep.mubr.f32.mxu1 %v1087_v50 }
 0x2a7   : > { %v502_v56 = vmul.f32 %v1522_v3, %v486_v31 }
 0x2a8   : > { %v971_v49 = vpop.eup %970 }
 0x2a9   : > { %618 = vmatmul.mubr.f32.gmra.mrb[14].mxu1 %v502_v56  ;;  %v453_v44 = vpop.xlane.xlu1 %452  ;;  %v487_v54 = vmul.f32 %v971_v49, %v1565_v51 }
 0x2aa   : > { %976 = vrcp.f32 %v453_v44  ;;  %623 = vmatprep.mubr.f32.mxu1 %v1087_v50 }
 0x2ab   : > { %v503_v55 = vmul.f32 %v1529_v20, %v487_v54 }
 0x2ac   : > { %v973_v47 = vpop.eup %972 }
 0x2ad   : > { %v455_v59 = vpop.xlane.xlu0 %454  ;;  %624 = vmatmul.mubr.f32.gmra.mrb[16].mxu1 %v503_v55  ;;  %v488_v52 = vmul.f32 %v973_v47, %v1565_v51 }
 0x2ae   : > { %978 = vrcp.f32 %v455_v59  ;;  %629 = vmatprep.mubr.f32.mxu1 %v1087_v50 }
 0x2af   : > { %v504_v3 = vmul.f32 %v1535_v25, %v488_v52 }
 0x2b0   : > { %v975_v58 = vpop.eup %974 }
 0x2b1   : > { %630 = vmatmul.mubr.f32.gmra.mrb[18].mxu1 %v504_v3  ;;  %v457_v57 = vpop.xlane.xlu1 %456  ;;  %v489_v62 = vmul.f32 %v975_v58, %v1565_v51 }
 0x2b2   : > { %980 = vrcp.f32 %v457_v57  ;;  %635 = vmatprep.mubr.f32.mxu1 %v1087_v50 }
 0x2b3   : > { %v505_v20 = vmul.f32 %v1541_v32, %v489_v62 }
 0x2b4   : > { %v977_v60 = vpop.eup %976 }
 0x2b5   : > { %v459_v61 = vpop.xlane.xlu0 %458  ;;  %636 = vmatmul.mubr.f32.gmra.mrb[20].mxu1 %v505_v20  ;;  %v490_v8 = vmul.f32 %v977_v60, %v1565_v51 }
 0x2b6   : > { %982 = vrcp.f32 %v459_v61  ;;  %641 = vmatprep.mubr.f32.mxu1 %v1087_v50 }
 0x2b7   : > { %v506_v25 = vmul.f32 %v1547_v43, %v490_v8 }
 0x2b8   : > { %v979_v63 = vpop.eup %978 }
 0x2b9   : > { %642 = vmatmul.mubr.f32.gmra.mrb[22].mxu1 %v506_v25  ;;  %v461_v7 = vpop.xlane.xlu1 %460  ;;  %v491_v19 = vmul.f32 %v979_v63, %v1565_v51 }
 0x2ba   : > { %984 = vrcp.f32 %v461_v7  ;;  %647 = vmatprep.mubr.f32.mxu1 %v1087_v50 }
 0x2bb   : > { %v507_v32 = vmul.f32 %v1553_v14, %v491_v19 }
 0x2bc   : > { %v981_v53 = vpop.eup %980 }
 0x2bd   : > { %648 = vmatmul.mubr.f32.gmra.mrb[24].mxu1 %v507_v32  ;;  %v492_v48 = vmul.f32 %v981_v53, %v1565_v51 }
 0x2be   : > { %653 = vmatprep.mubr.f32.mxu1 %v1087_v50 }
 0x2bf   : > { %v508_v13 = vmul.f32 %v1556_v37, %v492_v48 }
 0x2c0   : > { %v983_v43 = vpop.eup %982 }
 0x2c1   : > { %654 = vmatmul.mubr.f32.gmra.mrb[26].mxu1 %v508_v13  ;;  %v493_v31 = vmul.f32 %v983_v43, %v1565_v51 }
 0x2c2   : > { %659 = vmatprep.mubr.f32.mxu1 %v1087_v50 }
 0x2c3   : > { %v509_v56 = vmul.f32 %v1559_v38, %v493_v31 }
 0x2c4   : > { %v985_v49 = vpop.eup %984 }
 0x2c5   : > { %660 = vmatmul.mubr.f32.gmra.mrb[28].mxu1 %v509_v56  ;;  %v494_v14 = vmul.f32 %v985_v49, %v1565_v51 }
 0x2c6   : > { %665 = vmatprep.mubr.f32.mxu1 %v1087_v50 }
 0x2c7   : > { %v510_v44 = vmul.f32 %v1562_v26, %v494_v14 }
 0x2c9   : > { %666 = vmatmul.mubr.f32.gmra.mrb[30].mxu1 %v510_v44 }
 0x360   : > { %v577_v54 = vpop.f32.mrb[0].mxu1 }
 0x361   : > { %v578_v37 = vadd.f32 %v577_v54, %v1232_v2  ;;  %v579_v55 = vpop.f32.mrb[1].mxu1 }
 0x362   : > { %v580_v47 = vadd.f32 %v579_v55, %v1226_v0 }
 0x363   : > { %672 = vst [vmem:[%s1618_s29] sm:$0xff] %v578_v37 }
 0x364   : > { %673 = vst [vmem:[%s1618_s29 + $0x8] sm:$0xff] %v580_v47  ;;  %v583_v50 = vpop.f32.mrb[2].mxu1 }
 0x365   : > { %v584_v38 = vadd.f32 %v583_v50, %v1237_v4  ;;  %v585_v2 = vpop.f32.mrb[3].mxu1 }
 0x366   : > { %v586_v26 = vadd.f32 %v585_v2, %v1229_v1 }
 0x367   : > { %674 = vst [vmem:[%s1618_s29 + $0x10] sm:$0xff] %v584_v38 }
 0x368   : > { %675 = vst [vmem:[%s1618_s29 + $0x18] sm:$0xff] %v586_v26  ;;  %v589_v0 = vpop.f32.mrb[4].mxu1 }
 0x369   : > { %v590_v51 = vadd.f32 %v589_v0, %v1251_v9  ;;  %v591_v59 = vpop.f32.mrb[5].mxu1 }
 0x36a   : > { %v592_v52 = vadd.f32 %v591_v59, %v1240_v5 }
 0x36b   : > { %676 = vst [vmem:[%s1618_s29 + $0x20] sm:$0xff] %v590_v51 }
 0x36c   : > { %677 = vst [vmem:[%s1618_s29 + $0x28] sm:$0xff] %v592_v52  ;;  %v595_v3 = vpop.f32.mrb[6].mxu1 }
 0x36d   : > { %v596_v4 = vadd.f32 %v595_v3, %v1254_v10  ;;  %v597_v58 = vpop.f32.mrb[7].mxu1 }
 0x36e   : > { %v598_v1 = vadd.f32 %v597_v58, %v1243_v6 }
 0x36f   : > { %678 = vst [vmem:[%s1618_s29 + $0x30] sm:$0xff] %v596_v4 }
 0x370   : > { %679 = vst [vmem:[%s1618_s29 + $0x38] sm:$0xff] %v598_v1  ;;  %v601_v57 = vpop.f32.mrb[8].mxu1 }
 0x371   : > { %v602_v9 = vadd.f32 %v601_v57, %v1267_v15  ;;  %v603_v62 = vpop.f32.mrb[9].mxu1 }
 0x372   : > { %v604_v5 = vadd.f32 %v603_v62, %v1257_v11 }
 0x373   : > { %680 = vst [vmem:[%s1618_s29 + $0x40] sm:$0xff] %v602_v9 }
 0x374   : > { %681 = vst [vmem:[%s1618_s29 + $0x48] sm:$0xff] %v604_v5  ;;  %v607_v20 = vpop.f32.mrb[10].mxu1 }
 0x375   : > { %v608_v10 = vadd.f32 %v607_v20, %v1270_v16  ;;  %v609_v60 = vpop.f32.mrb[11].mxu1 }
 0x376   : > { %v610_v6 = vadd.f32 %v609_v60, %v1260_v12 }
 0x377   : > { %682 = vst [vmem:[%s1618_s29 + $0x50] sm:$0xff] %v608_v10 }
 0x378   : > { %683 = vst [vmem:[%s1618_s29 + $0x58] sm:$0xff] %v610_v6  ;;  %v613_v61 = vpop.f32.mrb[12].mxu1 }
 0x379   : > { %v614_v15 = vadd.f32 %v613_v61, %v1283_v21  ;;  %v615_v8 = vpop.f32.mrb[13].mxu1 }
 0x37a   : > { %v616_v11 = vadd.f32 %v615_v8, %v1273_v17 }
 0x37b   : > { %684 = vst [vmem:[%s1618_s29 + $0x60] sm:$0xff] %v614_v15 }
 0x37c   : > { %685 = vst [vmem:[%s1618_s29 + $0x68] sm:$0xff] %v616_v11  ;;  %v619_v25 = vpop.f32.mrb[14].mxu1 }
 0x37d   : > { %v620_v16 = vadd.f32 %v619_v25, %v1286_v22  ;;  %v621_v63 = vpop.f32.mrb[15].mxu1 }
 0x37e   : > { %v622_v12 = vadd.f32 %v621_v63, %v1276_v18 }
 0x37f   : > { %686 = vst [vmem:[%s1618_s29 + $0x70] sm:$0xff] %v620_v16 }
 0x380   : > { %687 = vst [vmem:[%s1618_s29 + $0x78] sm:$0xff] %v622_v12  ;;  %v625_v7 = vpop.f32.mrb[16].mxu1 }
 0x381   : > { %v626_v21 = vadd.f32 %v625_v7, %v1299_v27  ;;  %v627_v19 = vpop.f32.mrb[17].mxu1 }
 0x382   : > { %v628_v17 = vadd.f32 %v627_v19, %v1289_v23 }
 0x383   : > { %688 = vst [vmem:[%s1618_s29 + $0x80] sm:$0xff] %v626_v21 }
 0x384   : > { %689 = vst [vmem:[%s1618_s29 + $0x88] sm:$0xff] %v628_v17  ;;  %v631_v32 = vpop.f32.mrb[18].mxu1 }
 0x385   : > { %v632_v22 = vadd.f32 %v631_v32, %v1302_v28  ;;  %v633_v53 = vpop.f32.mrb[19].mxu1 }
 0x386   : > { %v634_v18 = vadd.f32 %v633_v53, %v1292_v24 }
 0x387   : > { %690 = vst [vmem:[%s1618_s29 + $0x90] sm:$0xff] %v632_v22 }
 0x388   : > { %691 = vst [vmem:[%s1618_s29 + $0x98] sm:$0xff] %v634_v18  ;;  %v637_v48 = vpop.f32.mrb[20].mxu1 }
 0x389   : > { %v638_v27 = vadd.f32 %v637_v48, %v1315_v33  ;;  %v639_v13 = vpop.f32.mrb[21].mxu1 }
 0x38a   : > { %v640_v23 = vadd.f32 %v639_v13, %v1305_v29 }
 0x38b   : > { %692 = vst [vmem:[%s1618_s29 + $0xa0] sm:$0xff] %v638_v27 }
 0x38c   : > { %693 = vst [vmem:[%s1618_s29 + $0xa8] sm:$0xff] %v640_v23  ;;  %v643_v43 = vpop.f32.mrb[22].mxu1 }
 0x38d   : > { %v644_v28 = vadd.f32 %v643_v43, %v1318_v34  ;;  %v645_v31 = vpop.f32.mrb[23].mxu1 }
 0x38e   : > { %v646_v24 = vadd.f32 %v645_v31, %v1308_v30 }
 0x38f   : > { %694 = vst [vmem:[%s1618_s29 + $0xb0] sm:$0xff] %v644_v28 }
 0x390   : > { %695 = vst [vmem:[%s1618_s29 + $0xb8] sm:$0xff] %v646_v24  ;;  %v649_v56 = vpop.f32.mrb[24].mxu1 }
 0x391   : > { %v650_v33 = vadd.f32 %v649_v56, %v1331_v39  ;;  %v651_v49 = vpop.f32.mrb[25].mxu1 }
 0x392   : > { %v652_v29 = vadd.f32 %v651_v49, %v1321_v35 }
 0x393   : > { %696 = vst [vmem:[%s1618_s29 + $0xc0] sm:$0xff] %v650_v33 }
 0x394   : > { %697 = vst [vmem:[%s1618_s29 + $0xc8] sm:$0xff] %v652_v29  ;;  %v655_v14 = vpop.f32.mrb[26].mxu1 }
 0x395   : > { %v656_v34 = vadd.f32 %v655_v14, %v1334_v40  ;;  %v657_v44 = vpop.f32.mrb[27].mxu1 }
 0x396   : > { %v658_v30 = vadd.f32 %v657_v44, %v1324_v36 }
 0x397   : > { %698 = vst [vmem:[%s1618_s29 + $0xd0] sm:$0xff] %v656_v34 }
 0x398   : > { %699 = vst [vmem:[%s1618_s29 + $0xd8] sm:$0xff] %v658_v30  ;;  %v661_v54 = vpop.f32.mrb[28].mxu1 }
 0x399   : > { %v662_v39 = vadd.f32 %v661_v54, %v1347_v45  ;;  %v663_v37 = vpop.f32.mrb[29].mxu1 }
 0x39a   : > { %v664_v35 = vadd.f32 %v663_v37, %v1337_v41 }
 0x39b   : > { %700 = vst [vmem:[%s1618_s29 + $0xe0] sm:$0xff] %v662_v39 }
 0x39c   : > { %701 = vst [vmem:[%s1618_s29 + $0xe8] sm:$0xff] %v664_v35  ;;  %v667_v40 = vpop.f32.mrb[30].mxu1 }
 0x39d   : > { %v668_v55 = vadd.f32 %v667_v40, %v1350_v46  ;;  %v669_v36 = vpop.f32.mrb[31].mxu1 }
 0x39e   : > { %v670_v41 = vadd.f32 %v669_v36, %v1340_v42 }
 0x39f   : > { %702 = vst [vmem:[%s1618_s29 + $0xf0] sm:$0xff] %v668_v55 }
 0x3a0   : > { %703 = vst [vmem:[%s1618_s29 + $0xf8] sm:$0xff] %v670_v41 }
 0x3a1   : > { %1029 = shalt.err (!%p1026_p2)
}
 0x3a2   : > { %s1030_s18 = scalar_lea.hbm %s1684_s8, 4096  ;;  %s1034_s25 = scalar_lea.hbm %s1735_s2, 8192 }
 0x3a3   : > { %p1031_p4 = scmp.ne.s32.totalorder %s1684_s8, %s1030_s18  ;;  %p1035_p9 = scmp.lt.u32.totalorder %s1684_s8, %s1735_s2 }
 0x3a4   : > { %p1036_p1 = scmp.lt.u32.totalorder %s1034_s25, %s1030_s18  ;;  %p1038_p6 = scmp.lt.u32.totalorder %s1030_s18, %s1684_s8 }
 0x3a5   : > { %p1032_p5 = pnand %p1031_p4, %p1742_p11 }
 0x3a6   : > { %p1037_p3 = por %p1036_p1, %p1035_p9 }
 0x3a7   : > { %p1033_p7 = pneg %p1032_p5 }
 0x3a8   : > { %p1039_p12 = por %p1038_p6, %p1037_p3 }
 0x3aa   : > { %p1040_p13 = pnand %p1039_p12, %p1033_p7 }
 0x3ac   : > { %1043 = shalt.err (!%p1040_p13)
}
 0x3ad   : > { %s1089_s30 = smov 256   ;;  %s1090_s6 = smov 16  }
 0x3ae   : > { %873 = dma.vmem_to_hbm [thread:$0]  (%p1742_p11), %s1686_s4, 4096, %s1684_s8, %s705_s0, %s1089_s30, %s1089_s30, %s1090_s6  }
 0x3af PF: > { %s733_s21 = sand.u32 1, %s1070_s11   ;;  %p1743_p8 = scmp.ne.s32.totalorder %s1740_s23, 0 }
 0x3b0   : > { %p1744_p10 = scmp.ge.s32.totalorder %s1082_s14, 2  ;;  %s734_s29 = scalar_lea.sflag [#allocation6], %s733_s21 }
 0x3b2   : > { %p880_p0 = pnand %p1744_p10, %p1743_p8 }
 0x3b4   : > { %1065 = dma.done.wait (!%p880_p0), %s734_s29, 4096  }
 0x3b5   : > { %1067 = vsyncadd (!%p880_p0), %s734_s29, 4294963200  ;;  %p16_p2 = scmp.ge.s32.totalorder %s1134_s16, 4   ;;  %s1745_s11 = smov %s1074_s12 }
 0x3b6   : > { %s1746_s12 = smov %s1078_s13  ;;  %s1747_s13 = smov %s1146_s19 }
 0x3b7   : > { %s1748_s14 = smov %s1134_s16  ;;  %18 = sbr.rel (!%p16_p2) target bundleno = 7 (0x7), region = 69 }
 0x3be   :  { %739 = vsyncpa [#allocation5], 1 }
 0x3bf   :  { %741 = vsyncpa [#allocation5 + $0x1], 1 }
 0x3c0   :  { %742 = vsyncpa [#allocation6], 1 }
 0x3c1   :  { %744 = vsyncpa [#allocation6 + $0x1], 1 }

</bundles_post_ra>
